<compile_context>
chip_gen: v7x
topology: tpu7x:2x2x1
jax: 0.10.0
libtpu: 0.0.40
codegen_flags: <defaults>
</compile_context>

<pallas_src>
import functools
import math

import jax
import jax.numpy as jnp
from jax.experimental import pallas as pl
from jax.experimental.pallas import tpu as pltpu


_VMEM_LIMIT = 48 * 1024 * 1024  # < v7x 64 MiB physical VMEM, > default scoped limits


def _pick_tile(dim, preferred):
    """Largest preferred tile evenly dividing `dim`; else the full dim.

    Tiles returned are either (8,128)-aligned or full-extent, so every BlockSpec
    satisfies the Mosaic block-shape constraint and grids divide exactly.
    """
    for t in preferred:
        if dim % t == 0:
            return t
    return dim


# ----------------------------------------------------------------------------
# Tiled linear (x @ W + b) kernel — fused QKV projection
# ----------------------------------------------------------------------------
def _linear_kernel(x_ref, w_ref, b_ref, o_ref, acc_ref):
    """Computes one (tm, tn) output tile; K is the innermost ("arbitrary") axis."""
    @pl.when(pl.program_id(2) == 0)
    def _():
        acc_ref[...] = jnp.zeros_like(acc_ref)

    acc_ref[...] += jnp.dot(x_ref[...], w_ref[...],
                            preferred_element_type=jnp.float32)

    @pl.when(pl.program_id(2) == pl.num_programs(2) - 1)
    def _():
        o_ref[...] = (acc_ref[...] + b_ref[...]).astype(o_ref.dtype)


def pallas_linear(x, w, b):
    """x: (M, K); w: (K, N) already in (in, out) layout; b: (1, N)."""
    M, K = x.shape
    K2, N = w.shape
    assert K == K2
    tm = _pick_tile(M, (256, 128))
    tn = _pick_tile(N, (512, 256, 128))
    tk = _pick_tile(K, (512, 256, 128))
    grid = (M // tm, N // tn, K // tk)
    return pl.pallas_call(
        _linear_kernel,
        out_shape=jax.ShapeDtypeStruct((M, N), x.dtype),
        grid_spec=pltpu.PrefetchScalarGridSpec(
            num_scalar_prefetch=0,
            grid=grid,
            in_specs=[
                pl.BlockSpec((tm, tk), lambda i, j, k: (i, k)),
                pl.BlockSpec((tk, tn), lambda i, j, k: (k, j)),
                pl.BlockSpec((1, tn), lambda i, j, k: (0, j)),
            ],
            out_specs=pl.BlockSpec((tm, tn), lambda i, j, k: (i, j)),
            scratch_shapes=[pltpu.VMEM((tm, tn), jnp.float32)],
        ),
        compiler_params=pltpu.CompilerParams(
            dimension_semantics=("parallel", "parallel", "arbitrary"),
            vmem_limit_bytes=_VMEM_LIMIT,
        ),
    )(x, w, b)


# ----------------------------------------------------------------------------
# Flash (online-softmax) attention kernel with the fused output projection
# applied in the epilogue.  All H heads of one batch element live in a block.
# ----------------------------------------------------------------------------
def _flash_attn_outproj_kernel(q_ref, k_ref, v_ref, w_ref, b_ref, o_ref,
                               m_ref, l_ref, acc_ref):
    kv = pl.program_id(2)

    @pl.when(kv == 0)
    def _():
        m_ref[...] = jnp.full_like(m_ref, -jnp.inf)
        l_ref[...] = jnp.zeros_like(l_ref)
        acc_ref[...] = jnp.zeros_like(acc_ref)

    # Softmax scale is pre-folded into the fused Q projection weights.
    q = q_ref[0]                                  # (H, tq, D)
    k = k_ref[0]                                  # (H, tk, D)
    v = v_ref[0]                                  # (H, tk, D)

    # Batched q @ k^T: contraction over D on the MXU, no explicit in-kernel .T
    s = jnp.einsum("hqd,hkd->hqk", q, k, preferred_element_type=jnp.float32)

    m_prev = m_ref[...]
    m_new = jnp.maximum(m_prev, s.max(axis=-1, keepdims=True))
    alpha = jnp.exp(m_prev - m_new)
    p = jnp.exp(s - m_new)
    l_ref[...] = alpha * l_ref[...] + p.sum(axis=-1, keepdims=True)
    acc_ref[...] = alpha * acc_ref[...] + jnp.einsum(
        "hqk,hkd->hqd", p.astype(v.dtype), v, preferred_element_type=jnp.float32)
    m_ref[...] = m_new

    @pl.when(kv == pl.num_programs(2) - 1)
    def _():
        inv_l = pl.reciprocal(l_ref[...], approx=True)   # EUP slot, essentially free
        o = acc_ref[...] * inv_l                         # (H, tq, D), f32
        H = o.shape[0]
        # Fused (out_proj ∘ MHA.out_proj):  out = sum_h o[h] @ W_out[h] + b_out.
        # Per-head MXU matmuls avoid any in-kernel transpose of the head axis.
        proj = jnp.dot(o[0], w_ref[0], preferred_element_type=jnp.float32)
        for h in range(1, H):
            proj = proj + jnp.dot(o[h], w_ref[h], preferred_element_type=jnp.float32)
        o_ref[0] = (proj + b_ref[...]).astype(o_ref.dtype)


def pallas_flash_attention_outproj(qkv_t, w_out_h, b_out, *, num_heads):
    """qkv_t: (B, 3H, T, D) with groups ordered [q heads | k heads | v heads].

    w_out_h: (H, D, E) per-head split of the fused output weight (in, out layout).
    b_out:   (1, E).  Returns the final module output (B, T, E).
    """
    B, G, T, D = qkv_t.shape
    H = num_heads
    assert G == 3 * H
    E = H * D
    tq = _pick_tile(T, (256, 128))
    tk = _pick_tile(T, (256, 128))
    grid = (B, T // tq, T // tk)
    return pl.pallas_call(
        _flash_attn_outproj_kernel,
        out_shape=jax.ShapeDtypeStruct((B, T, E), qkv_t.dtype),
        grid_spec=pltpu.PrefetchScalarGridSpec(
            num_scalar_prefetch=0,
            grid=grid,
            in_specs=[
                # q / k / v views of the same packed array, selected via the
                # size-H block index on the group axis (0 -> q, 1 -> k, 2 -> v).
                pl.BlockSpec((1, H, tq, D), lambda b, qi, ki: (b, 0, qi, 0)),
                pl.BlockSpec((1, H, tk, D), lambda b, qi, ki: (b, 1, ki, 0)),
                pl.BlockSpec((1, H, tk, D), lambda b, qi, ki: (b, 2, ki, 0)),
                # Fused output projection weight/bias: resident (constant block idx).
                pl.BlockSpec((H, D, E), lambda b, qi, ki: (0, 0, 0)),
                pl.BlockSpec((1, E), lambda b, qi, ki: (0, 0)),
            ],
            out_specs=pl.BlockSpec((1, tq, E), lambda b, qi, ki: (b, qi, 0)),
            scratch_shapes=[
                pltpu.VMEM((H, tq, 1), jnp.float32),   # running max  m
                pltpu.VMEM((H, tq, 1), jnp.float32),   # running sum  l
                pltpu.VMEM((H, tq, D), jnp.float32),   # output accumulator
            ],
        ),
        compiler_params=pltpu.CompilerParams(
            dimension_semantics=("parallel", "parallel", "arbitrary"),
            vmem_limit_bytes=_VMEM_LIMIT,
        ),
    )(qkv_t, qkv_t, qkv_t, w_out_h, b_out)


# ----------------------------------------------------------------------------
# One-time parameter preparation: algebraic fusion of chained Linears
# ----------------------------------------------------------------------------
def prepare_params(params, embed_dim, num_heads):
    """Fuse (in_proj ∘ {q,k,v}_proj) and (out_proj ∘ mha.out_proj) weight pairs.

    torch Linear: y = x @ W^T + b with W: (out, in).  Composition gives
      W_fused = W2 @ W1,  b_fused = W2 @ b1 + b2.
    Fused weights are stored pre-transposed to (in, out); the three fused QKV
    projections are packed into a single (E, 3E) matrix (columns ordered
    [q head0..H-1 | k heads | v heads]); the softmax scale is folded into the
    fused Q weight/bias; the fused output weight is pre-split per head (H, D, E).
    """
    E = embed_dim
    H = num_heads
    D = E // H
    scale = 1.0 / math.sqrt(D)
    in_w, in_b = params["in_w"], params["in_b"]          # (3E, E), (3E,)
    w_cols, b_parts = [], []
    for idx, (w, b) in enumerate(
        ((params["q_w"], params["q_b"]),
         (params["k_w"], params["k_b"]),
         (params["v_w"], params["v_b"]))):
        w_in = in_w[idx * E:(idx + 1) * E]               # (E, E)
        b_in = in_b[idx * E:(idx + 1) * E]               # (E,)
        w_f = jnp.transpose(w_in @ w)                    # (E_in, E_out)
        b_f = w_in @ b + b_in
        if idx == 0:                                     # fold 1/sqrt(D) into Q
            w_f = w_f * scale
            b_f = b_f * scale
        w_cols.append(w_f)
        b_parts.append(b_f)
    w_out = jnp.transpose(params["out_w"] @ params["mha_out_w"])   # (E_in, E_out)
    b_out = params["out_w"] @ params["mha_out_b"] + params["out_b"]
    return {
        "w_qkv": jnp.concatenate(w_cols, axis=1),        # (E, 3E)
        "b_qkv": jnp.concatenate(b_parts).reshape(1, 3 * E),
        "w_out_h": w_out.reshape(H, D, E),               # per-head split, (in,out)
        "b_out": b_out.reshape(1, E),
    }


# ----------------------------------------------------------------------------
# Module forward (hot path = 2 pallas_calls + one layout transpose)
# ----------------------------------------------------------------------------
def attention_forward(x, fused, num_heads):
    # TODO(synk): attention_mask / layer_head_mask / padding_mask are not
    # implemented; this is the module's default (mask-free, dropout=0) path.
    B, T, E = x.shape
    H = num_heads
    D = E // H

    x2 = x.reshape(B * T, E)

    # Single fused projection: [q2 | k2 | v2] = x @ W_qkv + b_qkv (one pallas_call)
    qkv = pallas_linear(x2, fused["w_qkv"], fused["b_qkv"])        # (B*T, 3E)

    # Only remaining layout op: split heads into the (B, 3H, T, D) layout the
    # flash kernel consumes (group axis = [q heads | k heads | v heads]).
    qkv_t = qkv.reshape(B, T, 3 * H, D).transpose(0, 2, 1, 3)      # (B, 3H, T, D)

    # Flash attention + fused (out_proj ∘ MHA.out_proj) epilogue (one pallas_call).
    out = pallas_flash_attention_outproj(qkv_t, fused["w_out_h"], fused["b_out"],
                                         num_heads=H)              # (B, T, E)
    return out


# ----------------------------------------------------------------------------
# Pure-JAX reference (unfused, follows the PyTorch module step by step)
# ----------------------------------------------------------------------------
def attention_reference(x, params, num_heads):
    B, T, E = x.shape
    H = num_heads
    D = E // H
    scale = 1.0 / math.sqrt(D)

    def lin(t, w, b):
        return t @ w.T + b

    q = lin(x, params["q_w"], params["q_b"])
    k = lin(x, params["k_w"], params["k_b"])
    v = lin(x, params["v_w"], params["v_b"])
    q2 = lin(q, params["in_w"][:E], params["in_b"][:E])
    k2 = lin(k, params["in_w"][E:2 * E], params["in_b"][E:2 * E])
    v2 = lin(v, params["in_w"][2 * E:], params["in_b"][2 * E:])

    def sh(t):
        return t.reshape(B, T, H, D).transpose(0, 2, 1, 3)

    qh, kh, vh = sh(q2), sh(k2), sh(v2)
    s = jnp.einsum("bhqd,bhkd->bhqk", qh * scale, kh)
    p = jax.nn.softmax(s, axis=-1)
    o = jnp.einsum("bhqk,bhkd->bhqd", p, vh)
    o = o.transpose(0, 2, 1, 3).reshape(B, T, E)
    o = lin(o, params["mha_out_w"], params["mha_out_b"])
    return lin(o, params["out_w"], params["out_b"])


# ----------------------------------------------------------------------------
# Deterministic parameter init (shapes from Attention.__init__)
# ----------------------------------------------------------------------------
def init_params(key, embed_dim):
    E = embed_dim
    ks = jax.random.split(key, 12)
    n = lambda k, shape: (jax.random.normal(k, shape, jnp.float32) * 0.05)
    return {
        "q_w": n(ks[0], (E, E)),  "q_b": n(ks[1], (E,)),
        "k_w": n(ks[2], (E, E)),  "k_b": n(ks[3], (E,)),
        "v_w": n(ks[4], (E, E)),  "v_b": n(ks[5], (E,)),
        "in_w": n(ks[6], (3 * E, E)), "in_b": n(ks[7], (3 * E,)),
        "mha_out_w": n(ks[8], (E, E)), "mha_out_b": n(ks[9], (E,)),
        "out_w": n(ks[10], (E, E)), "out_b": n(ks[11], (E,)),
    }


if __name__ == "__main__":
    B, T, E, H = 2, 8, 32, 4  # batch, seq, embed_dim, num_heads (head_dim = 8)

    key = jax.random.PRNGKey(0)
    k_x, k_p = jax.random.split(key)
    x = jax.random.normal(k_x, (B, T, E), jnp.float32)
    params = init_params(k_p, E)
    fused = prepare_params(params, E, H)   # one-time weight fusion, outside hot path

    fwd = jax.jit(functools.partial(attention_forward, num_heads=H))
    out = jax.block_until_ready(fwd(x, fused))

    ref = attention_reference(x, params, H)
    assert out.shape == (B, T, E)
    # 5e-4 tolerance: algebraic weight fusion, scale folding and approx reciprocal
    # perturb results at the ~1e-5 level for this scale; comfortably within bound.
    assert jnp.allclose(out, ref, atol=5e-4, rtol=5e-4), "mismatch vs reference"

    print("KERNEL_OK")
</pallas_src>

<mosaic_0001>
module attributes {stable_mosaic.version = 11 : i64} {
  func.func @_linear_kernel(%arg0: i32, %arg1: i32, %arg2: i32, %arg3: memref<16x32xf32, #tpu.memory_space<vmem>>, %arg4: memref<32x96xf32, #tpu.memory_space<vmem>>, %arg5: memref<1x96xf32, #tpu.memory_space<vmem>>, %arg6: memref<16x96xf32, #tpu.memory_space<vmem>>, %arg7: memref<16x96xf32, #tpu.memory_space<vmem>>) attributes {dimension_semantics = [#tpu.dimension_semantics<parallel>, #tpu.dimension_semantics<parallel>, #tpu.dimension_semantics<arbitrary>], iteration_bounds = array<i64: 1, 1, 1>, scalar_prefetch = 0 : i64, scratch_operands = 1 : i64, tpu.core_type = #tpu.core_type<tc>, window_params = [{transform_indices = @transform_0, window_bounds = array<i64: 16, 32>}, {transform_indices = @transform_1, window_bounds = array<i64: 32, 96>}, {transform_indices = @transform_2, window_bounds = array<i64: 1, 96>}, {transform_indices = @transform_3, window_bounds = array<i64: 16, 96>}]} {
    %c0_i32 = arith.constant 0 : i32
    %0 = arith.cmpi eq, %arg2, %c0_i32 : i32
    %1 = arith.extui %0 : i1 to i32
    %c0_i32_0 = arith.constant 0 : i32
    %2 = arith.cmpi ne, %1, %c0_i32_0 : i32
    scf.if %2 {
      %cst_10 = arith.constant 0.000000e+00 : f32
      %12 = vector.broadcast %cst_10 : f32 to vector<16x96xf32>
      %c0_11 = arith.constant 0 : index
      %c0_12 = arith.constant 0 : index
      %13 = vector.load %arg7[%c0_11, %c0_12] : memref<16x96xf32, #tpu.memory_space<vmem>>, vector<16x96xf32>
      tpu.vector_store %arg7[%c0_11, %c0_12], %12 {strides = array<i32>} : memref<16x96xf32, #tpu.memory_space<vmem>>, vector<16x96xf32>,
    } else {
    }
    %c0 = arith.constant 0 : index
    %c0_1 = arith.constant 0 : index
    %3 = vector.load %arg7[%c0, %c0_1] : memref<16x96xf32, #tpu.memory_space<vmem>>, vector<16x96xf32>
    %c0_2 = arith.constant 0 : index
    %c0_3 = arith.constant 0 : index
    %4 = vector.load %arg3[%c0_2, %c0_3] : memref<16x32xf32, #tpu.memory_space<vmem>>, vector<16x32xf32>
    %c0_4 = arith.constant 0 : index
    %c0_5 = arith.constant 0 : index
    %5 = vector.load %arg4[%c0_4, %c0_5] : memref<32x96xf32, #tpu.memory_space<vmem>>, vector<32x96xf32>
    %cst = arith.constant dense<0.000000e+00> : vector<16x96xf32>
    %6 = tpu.matmul %4, %5, %cst {dimension_numbers = #tpu.dot_dimension_numbers<[1], [0], [0], [1], [0, 0, 1, 1], [], []>} : vector<16x32xf32>, vector<32x96xf32>, vector<16x96xf32> -> vector<16x96xf32>
    %7 = arith.addf %3, %6 : vector<16x96xf32>
    %c0_6 = arith.constant 0 : index
    %c0_7 = arith.constant 0 : index
    %8 = vector.load %arg7[%c0_6, %c0_7] : memref<16x96xf32, #tpu.memory_space<vmem>>, vector<16x96xf32>
    tpu.vector_store %arg7[%c0_6, %c0_7], %7 {strides = array<i32>} : memref<16x96xf32, #tpu.memory_space<vmem>>, vector<16x96xf32>,
    %c0_i32_8 = arith.constant 0 : i32
    %9 = arith.cmpi eq, %arg2, %c0_i32_8 : i32
    %10 = arith.extui %9 : i1 to i32
    %c0_i32_9 = arith.constant 0 : i32
    %11 = arith.cmpi ne, %10, %c0_i32_9 : i32
    scf.if %11 {
      %c0_10 = arith.constant 0 : index
      %c0_11 = arith.constant 0 : index
      %12 = vector.load %arg7[%c0_10, %c0_11] : memref<16x96xf32, #tpu.memory_space<vmem>>, vector<16x96xf32>
      %c0_12 = arith.constant 0 : index
      %c0_13 = arith.constant 0 : index
      %13 = vector.load %arg5[%c0_12, %c0_13] : memref<1x96xf32, #tpu.memory_space<vmem>>, vector<1x96xf32>
      %14 = vector.broadcast %13 : vector<1x96xf32> to vector<16x96xf32>
      %15 = arith.addf %12, %14 : vector<16x96xf32>
      %c0_14 = arith.constant 0 : index
      %c0_15 = arith.constant 0 : index
      %16 = vector.load %arg6[%c0_14, %c0_15] : memref<16x96xf32, #tpu.memory_space<vmem>>, vector<16x96xf32>
      tpu.vector_store %arg6[%c0_14, %c0_15], %15 {strides = array<i32>} : memref<16x96xf32, #tpu.memory_space<vmem>>, vector<16x96xf32>,
    } else {
    }
    return
  }
  func.func @transform_0(%arg0: i32, %arg1: i32, %arg2: i32) -> (i32, i32) {
    %c0_i32 = arith.constant 0 : i32
    return %arg0, %arg2 : i32, i32
  }
  func.func @transform_1(%arg0: i32, %arg1: i32, %arg2: i32) -> (i32, i32) {
    %c0_i32 = arith.constant 0 : i32
    return %arg2, %arg1 : i32, i32
  }
  func.func @transform_2(%arg0: i32, %arg1: i32, %arg2: i32) -> (i32, i32) {
    %c0_i32 = arith.constant 0 : i32
    %c0_i32_0 = arith.constant 0 : i32
    return %c0_i32, %arg1 : i32, i32
  }
  func.func @transform_3(%arg0: i32, %arg1: i32, %arg2: i32) -> (i32, i32) {
    %c0_i32 = arith.constant 0 : i32
    return %arg0, %arg1 : i32, i32
  }
}

module attributes {stable_mosaic.version = 11 : i64} {
  func.func @_flash_attn_outproj_kernel(%arg0: i32, %arg1: i32, %arg2: i32, %arg3: memref<1x4x8x8xf32, #tpu.memory_space<vmem>>, %arg4: memref<1x4x8x8xf32, #tpu.memory_space<vmem>>, %arg5: memref<1x4x8x8xf32, #tpu.memory_space<vmem>>, %arg6: memref<4x8x32xf32, #tpu.memory_space<vmem>>, %arg7: memref<1x32xf32, #tpu.memory_space<vmem>>, %arg8: memref<1x8x32xf32, #tpu.memory_space<vmem>>, %arg9: memref<4x8x1xf32, #tpu.memory_space<vmem>>, %arg10: memref<4x8x1xf32, #tpu.memory_space<vmem>>, %arg11: memref<4x8x8xf32, #tpu.memory_space<vmem>>) attributes {dimension_semantics = [#tpu.dimension_semantics<parallel>, #tpu.dimension_semantics<parallel>, #tpu.dimension_semantics<arbitrary>], iteration_bounds = array<i64: 2, 1, 1>, scalar_prefetch = 0 : i64, scratch_operands = 3 : i64, tpu.core_type = #tpu.core_type<tc>, window_params = [{transform_indices = @transform_0, window_bounds = array<i64: 1, 4, 8, 8>}, {transform_indices = @transform_1, window_bounds = array<i64: 1, 4, 8, 8>}, {transform_indices = @transform_2, window_bounds = array<i64: 1, 4, 8, 8>}, {pipeline_mode = #tpu.pipeline_mode<synchronous>, transform_indices = @transform_3, window_bounds = array<i64: 4, 8, 32>}, {pipeline_mode = #tpu.pipeline_mode<synchronous>, transform_indices = @transform_4, window_bounds = array<i64: 1, 32>}, {transform_indices = @transform_5, window_bounds = array<i64: 1, 8, 32>}]} {
    %c0_i32 = arith.constant 0 : i32
    %0 = arith.cmpi eq, %arg2, %c0_i32 : i32
    %1 = arith.extui %0 : i1 to i32
    %c0_i32_0 = arith.constant 0 : i32
    %2 = arith.cmpi ne, %1, %c0_i32_0 : i32
    scf.if %2 {
      %cst_35 = arith.constant 0xFF800000 : f32
      %35 = vector.broadcast %cst_35 : f32 to vector<4x8x1xf32>
      %c0_36 = arith.constant 0 : index
      %c0_37 = arith.constant 0 : index
      %c0_38 = arith.constant 0 : index
      %36 = vector.load %arg9[%c0_36, %c0_37, %c0_38] : memref<4x8x1xf32, #tpu.memory_space<vmem>>, vector<4x8x1xf32>
      tpu.vector_store %arg9[%c0_36, %c0_37, %c0_38], %35 {strides = array<i32>} : memref<4x8x1xf32, #tpu.memory_space<vmem>>, vector<4x8x1xf32>,
      %cst_39 = arith.constant 0.000000e+00 : f32
      %37 = vector.broadcast %cst_39 : f32 to vector<4x8x1xf32>
      %c0_40 = arith.constant 0 : index
      %c0_41 = arith.constant 0 : index
      %c0_42 = arith.constant 0 : index
      %38 = vector.load %arg10[%c0_40, %c0_41, %c0_42] : memref<4x8x1xf32, #tpu.memory_space<vmem>>, vector<4x8x1xf32>
      tpu.vector_store %arg10[%c0_40, %c0_41, %c0_42], %37 {strides = array<i32>} : memref<4x8x1xf32, #tpu.memory_space<vmem>>, vector<4x8x1xf32>,
      %cst_43 = arith.constant 0.000000e+00 : f32
      %39 = vector.broadcast %cst_43 : f32 to vector<4x8x8xf32>
      %c0_44 = arith.constant 0 : index
      %c0_45 = arith.constant 0 : index
      %c0_46 = arith.constant 0 : index
      %40 = vector.load %arg11[%c0_44, %c0_45, %c0_46] : memref<4x8x8xf32, #tpu.memory_space<vmem>>, vector<4x8x8xf32>
      tpu.vector_store %arg11[%c0_44, %c0_45, %c0_46], %39 {strides = array<i32>} : memref<4x8x8xf32, #tpu.memory_space<vmem>>, vector<4x8x8xf32>,
    } else {
    }
    %c0 = arith.constant 0 : index
    %c0_1 = arith.constant 0 : index
    %c0_2 = arith.constant 0 : index
    %c0_3 = arith.constant 0 : index
    %3 = vector.load %arg3[%c0, %c0_1, %c0_2, %c0_3] : memref<1x4x8x8xf32, #tpu.memory_space<vmem>>, vector<1x4x8x8xf32>
    %4 = vector.shape_cast %3 : vector<1x4x8x8xf32> to vector<4x8x8xf32>
    %c0_4 = arith.constant 0 : index
    %c0_5 = arith.constant 0 : index
    %c0_6 = arith.constant 0 : index
    %c0_7 = arith.constant 0 : index
    %5 = vector.load %arg4[%c0_4, %c0_5, %c0_6, %c0_7] : memref<1x4x8x8xf32, #tpu.memory_space<vmem>>, vector<1x4x8x8xf32>
    %6 = vector.shape_cast %5 : vector<1x4x8x8xf32> to vector<4x8x8xf32>
    %c0_8 = arith.constant 0 : index
    %c0_9 = arith.constant 0 : index
    %c0_10 = arith.constant 0 : index
    %c0_11 = arith.constant 0 : index
    %7 = vector.load %arg5[%c0_8, %c0_9, %c0_10, %c0_11] : memref<1x4x8x8xf32, #tpu.memory_space<vmem>>, vector<1x4x8x8xf32>
    %8 = vector.shape_cast %7 : vector<1x4x8x8xf32> to vector<4x8x8xf32>
    "tpu.trace_start"() <{level = 10 : i32, message = "hqd,hkd->hqk"}> : () -> ()
    %cst = arith.constant dense<0.000000e+00> : vector<4x8x8xf32>
    %9 = tpu.matmul %4, %6, %cst {dimension_numbers = #tpu.dot_dimension_numbers<[2], [2], [1], [1], [0, 0, 0, 1, 1, 1], [0], [0]>} : vector<4x8x8xf32>, vector<4x8x8xf32>, vector<4x8x8xf32> -> vector<4x8x8xf32>
    "tpu.trace_stop"() : () -> ()
    %c0_12 = arith.constant 0 : index
    %c0_13 = arith.constant 0 : index
    %c0_14 = arith.constant 0 : index
    %10 = vector.load %arg9[%c0_12, %c0_13, %c0_14] : memref<4x8x1xf32, #tpu.memory_space<vmem>>, vector<4x8x1xf32>
    %cst_15 = arith.constant dense<0xFF800000> : vector<4x8xf32>
    %11 = vector.multi_reduction <maximumf>, %9, %cst_15 [2] : vector<4x8x8xf32> to vector<4x8xf32>
    %12 = vector.shape_cast %11 : vector<4x8xf32> to vector<4x8x1xf32>
    %13 = arith.maximumf %10, %12 : vector<4x8x1xf32>
    %14 = arith.subf %10, %13 : vector<4x8x1xf32>
    %15 = math.exp %14 : vector<4x8x1xf32>
    %16 = vector.broadcast %13 : vector<4x8x1xf32> to vector<4x8x8xf32>
    %17 = arith.subf %9, %16 : vector<4x8x8xf32>
    %18 = math.exp %17 : vector<4x8x8xf32>
    %c0_16 = arith.constant 0 : index
    %c0_17 = arith.constant 0 : index
    %c0_18 = arith.constant 0 : index
    %19 = vector.load %arg10[%c0_16, %c0_17, %c0_18] : memref<4x8x1xf32, #tpu.memory_space<vmem>>, vector<4x8x1xf32>
    %20 = arith.mulf %15, %19 : vector<4x8x1xf32>
    %cst_19 = arith.constant dense<0.000000e+00> : vector<4x8xf32>
    %21 = vector.multi_reduction <add>, %18, %cst_19 [2] : vector<4x8x8xf32> to vector<4x8xf32>
    %22 = vector.shape_cast %21 : vector<4x8xf32> to vector<4x8x1xf32>
    %23 = arith.addf %20, %22 : vector<4x8x1xf32>
    %c0_20 = arith.constant 0 : index
    %c0_21 = arith.constant 0 : index
    %c0_22 = arith.constant 0 : index
    %24 = vector.load %arg10[%c0_20, %c0_21, %c0_22] : memref<4x8x1xf32, #tpu.memory_space<vmem>>, vector<4x8x1xf32>
    tpu.vector_store %arg10[%c0_20, %c0_21, %c0_22], %23 {strides = array<i32>} : memref<4x8x1xf32, #tpu.memory_space<vmem>>, vector<4x8x1xf32>,
    %c0_23 = arith.constant 0 : index
    %c0_24 = arith.constant 0 : index
    %c0_25 = arith.constant 0 : index
    %25 = vector.load %arg11[%c0_23, %c0_24, %c0_25] : memref<4x8x8xf32, #tpu.memory_space<vmem>>, vector<4x8x8xf32>
    %26 = vector.broadcast %15 : vector<4x8x1xf32> to vector<4x8x8xf32>
    %27 = arith.mulf %26, %25 : vector<4x8x8xf32>
    "tpu.trace_start"() <{level = 10 : i32, message = "hqk,hkd->hqd"}> : () -> ()
    %cst_26 = arith.constant dense<0.000000e+00> : vector<4x8x8xf32>
    %28 = tpu.matmul %18, %8, %cst_26 {dimension_numbers = #tpu.dot_dimension_numbers<[2], [1], [1], [2], [0, 0, 0, 1, 1, 2], [0], [0]>} : vector<4x8x8xf32>, vector<4x8x8xf32>, vector<4x8x8xf32> -> vector<4x8x8xf32>
    "tpu.trace_stop"() : () -> ()
    %29 = arith.addf %27, %28 : vector<4x8x8xf32>
    %c0_27 = arith.constant 0 : index
    %c0_28 = arith.constant 0 : index
    %c0_29 = arith.constant 0 : index
    %30 = vector.load %arg11[%c0_27, %c0_28, %c0_29] : memref<4x8x8xf32, #tpu.memory_space<vmem>>, vector<4x8x8xf32>
    tpu.vector_store %arg11[%c0_27, %c0_28, %c0_29], %29 {strides = array<i32>} : memref<4x8x8xf32, #tpu.memory_space<vmem>>, vector<4x8x8xf32>,
    %c0_30 = arith.constant 0 : index
    %c0_31 = arith.constant 0 : index
    %c0_32 = arith.constant 0 : index
    %31 = vector.load %arg9[%c0_30, %c0_31, %c0_32] : memref<4x8x1xf32, #tpu.memory_space<vmem>>, vector<4x8x1xf32>
    tpu.vector_store %arg9[%c0_30, %c0_31, %c0_32], %13 {strides = array<i32>} : memref<4x8x1xf32, #tpu.memory_space<vmem>>, vector<4x8x1xf32>,
    %c0_i32_33 = arith.constant 0 : i32
    %32 = arith.cmpi eq, %arg2, %c0_i32_33 : i32
    %33 = arith.extui %32 : i1 to i32
    %c0_i32_34 = arith.constant 0 : i32
    %34 = arith.cmpi ne, %33, %c0_i32_34 : i32
    scf.if %34 {
      %c0_35 = arith.constant 0 : index
      %c0_36 = arith.constant 0 : index
      %c0_37 = arith.constant 0 : index
      %35 = vector.load %arg10[%c0_35, %c0_36, %c0_37] : memref<4x8x1xf32, #tpu.memory_space<vmem>>, vector<4x8x1xf32>
      %36 = tpu.reciprocal %35 {approx = true} : vector<4x8x1xf32> -> vector<4x8x1xf32>
      %c0_38 = arith.constant 0 : index
      %c0_39 = arith.constant 0 : index
      %c0_40 = arith.constant 0 : index
      %37 = vector.load %arg11[%c0_38, %c0_39, %c0_40] : memref<4x8x8xf32, #tpu.memory_space<vmem>>, vector<4x8x8xf32>
      %38 = vector.broadcast %36 : vector<4x8x1xf32> to vector<4x8x8xf32>
      %39 = arith.mulf %37, %38 : vector<4x8x8xf32>
      %40 = vector.extract_strided_slice %39 {offsets = [0, 0, 0], sizes = [1, 8, 8], strides = [1, 1, 1]} : vector<4x8x8xf32> to vector<1x8x8xf32>
      %41 = vector.shape_cast %40 : vector<1x8x8xf32> to vector<8x8xf32>
      %c0_41 = arith.constant 0 : index
      %c0_42 = arith.constant 0 : index
      %c0_43 = arith.constant 0 : index
      %42 = vector.load %arg6[%c0_41, %c0_42, %c0_43] : memref<4x8x32xf32, #tpu.memory_space<vmem>>, vector<1x8x32xf32>
      %43 = vector.shape_cast %42 : vector<1x8x32xf32> to vector<8x32xf32>
      %cst_44 = arith.constant dense<0.000000e+00> : vector<8x32xf32>
      %44 = tpu.matmul %41, %43, %cst_44 {dimension_numbers = #tpu.dot_dimension_numbers<[1], [0], [0], [1], [0, 0, 1, 1], [], []>} : vector<8x8xf32>, vector<8x32xf32>, vector<8x32xf32> -> vector<8x32xf32>
      %45 = vector.extract_strided_slice %39 {offsets = [1, 0, 0], sizes = [1, 8, 8], strides = [1, 1, 1]} : vector<4x8x8xf32> to vector<1x8x8xf32>
      %46 = vector.shape_cast %45 : vector<1x8x8xf32> to vector<8x8xf32>
      %c1 = arith.constant 1 : index
      %c0_45 = arith.constant 0 : index
      %c0_46 = arith.constant 0 : index
      %47 = vector.load %arg6[%c1, %c0_45, %c0_46] : memref<4x8x32xf32, #tpu.memory_space<vmem>>, vector<1x8x32xf32>
      %48 = vector.shape_cast %47 : vector<1x8x32xf32> to vector<8x32xf32>
      %cst_47 = arith.constant dense<0.000000e+00> : vector<8x32xf32>
      %49 = tpu.matmul %46, %48, %cst_47 {dimension_numbers = #tpu.dot_dimension_numbers<[1], [0], [0], [1], [0, 0, 1, 1], [], []>} : vector<8x8xf32>, vector<8x32xf32>, vector<8x32xf32> -> vector<8x32xf32>
      %50 = arith.addf %44, %49 : vector<8x32xf32>
      %51 = vector.extract_strided_slice %39 {offsets = [2, 0, 0], sizes = [1, 8, 8], strides = [1, 1, 1]} : vector<4x8x8xf32> to vector<1x8x8xf32>
      %52 = vector.shape_cast %51 : vector<1x8x8xf32> to vector<8x8xf32>
      %c2 = arith.constant 2 : index
      %c0_48 = arith.constant 0 : index
      %c0_49 = arith.constant 0 : index
      %53 = vector.load %arg6[%c2, %c0_48, %c0_49] : memref<4x8x32xf32, #tpu.memory_space<vmem>>, vector<1x8x32xf32>
      %54 = vector.shape_cast %53 : vector<1x8x32xf32> to vector<8x32xf32>
      %cst_50 = arith.constant dense<0.000000e+00> : vector<8x32xf32>
      %55 = tpu.matmul %52, %54, %cst_50 {dimension_numbers = #tpu.dot_dimension_numbers<[1], [0], [0], [1], [0, 0, 1, 1], [], []>} : vector<8x8xf32>, vector<8x32xf32>, vector<8x32xf32> -> vector<8x32xf32>
      %56 = arith.addf %50, %55 : vector<8x32xf32>
      %57 = vector.extract_strided_slice %39 {offsets = [3, 0, 0], sizes = [1, 8, 8], strides = [1, 1, 1]} : vector<4x8x8xf32> to vector<1x8x8xf32>
      %58 = vector.shape_cast %57 : vector<1x8x8xf32> to vector<8x8xf32>
      %c3 = arith.constant 3 : index
      %c0_51 = arith.constant 0 : index
      %c0_52 = arith.constant 0 : index
      %59 = vector.load %arg6[%c3, %c0_51, %c0_52] : memref<4x8x32xf32, #tpu.memory_space<vmem>>, vector<1x8x32xf32>
      %60 = vector.shape_cast %59 : vector<1x8x32xf32> to vector<8x32xf32>
      %cst_53 = arith.constant dense<0.000000e+00> : vector<8x32xf32>
      %61 = tpu.matmul %58, %60, %cst_53 {dimension_numbers = #tpu.dot_dimension_numbers<[1], [0], [0], [1], [0, 0, 1, 1], [], []>} : vector<8x8xf32>, vector<8x32xf32>, vector<8x32xf32> -> vector<8x32xf32>
      %62 = arith.addf %56, %61 : vector<8x32xf32>
      %c0_54 = arith.constant 0 : index
      %c0_55 = arith.constant 0 : index
      %63 = vector.load %arg7[%c0_54, %c0_55] : memref<1x32xf32, #tpu.memory_space<vmem>>, vector<1x32xf32>
      %64 = vector.broadcast %63 : vector<1x32xf32> to vector<8x32xf32>
      %65 = arith.addf %62, %64 : vector<8x32xf32>
      %c0_56 = arith.constant 0 : index
      %c0_57 = arith.constant 0 : index
      %c0_58 = arith.constant 0 : index
      %66 = vector.load %arg8[%c0_56, %c0_57, %c0_58] : memref<1x8x32xf32, #tpu.memory_space<vmem>>, vector<1x8x32xf32>
      %67 = vector.shape_cast %66 : vector<1x8x32xf32> to vector<8x32xf32>
      %68 = vector.shape_cast %65 : vector<8x32xf32> to vector<1x8x32xf32>
      tpu.vector_store %arg8[%c0_56, %c0_57, %c0_58], %68 {strides = array<i32>} : memref<1x8x32xf32, #tpu.memory_space<vmem>>, vector<1x8x32xf32>,
    } else {
    }
    return
  }
  func.func @transform_0(%arg0: i32, %arg1: i32, %arg2: i32) -> (i32, i32, i32, i32) {
    %c0_i32 = arith.constant 0 : i32
    %c0_i32_0 = arith.constant 0 : i32
    %c0_i32_1 = arith.constant 0 : i32
    return %arg0, %c0_i32, %arg1, %c0_i32_0 : i32, i32, i32, i32
  }
  func.func @transform_1(%arg0: i32, %arg1: i32, %arg2: i32) -> (i32, i32, i32, i32) {
    %c1_i32 = arith.constant 1 : i32
    %c0_i32 = arith.constant 0 : i32
    %c0_i32_0 = arith.constant 0 : i32
    return %arg0, %c1_i32, %arg2, %c0_i32 : i32, i32, i32, i32
  }
  func.func @transform_2(%arg0: i32, %arg1: i32, %arg2: i32) -> (i32, i32, i32, i32) {
    %c2_i32 = arith.constant 2 : i32
    %c0_i32 = arith.constant 0 : i32
    %c0_i32_0 = arith.constant 0 : i32
    return %arg0, %c2_i32, %arg2, %c0_i32 : i32, i32, i32, i32
  }
  func.func @transform_3(%arg0: i32, %arg1: i32, %arg2: i32) -> (i32, i32, i32) {
    %c0_i32 = arith.constant 0 : i32
    %c0_i32_0 = arith.constant 0 : i32
    %c0_i32_1 = arith.constant 0 : i32
    %c0_i32_2 = arith.constant 0 : i32
    return %c0_i32, %c0_i32_0, %c0_i32_1 : i32, i32, i32
  }
  func.func @transform_4(%arg0: i32, %arg1: i32, %arg2: i32) -> (i32, i32) {
    %c0_i32 = arith.constant 0 : i32
    %c0_i32_0 = arith.constant 0 : i32
    %c0_i32_1 = arith.constant 0 : i32
    return %c0_i32, %c0_i32_0 : i32, i32
  }
  func.func @transform_5(%arg0: i32, %arg1: i32, %arg2: i32) -> (i32, i32, i32) {
    %c0_i32 = arith.constant 0 : i32
    %c0_i32_0 = arith.constant 0 : i32
    return %arg0, %arg1, %c0_i32 : i32, i32, i32
  }
}

</mosaic_0001>

<bundles_post_ra>
// kernel: attention_forward.2
= control target key start
LH: loop header
LB: loop body
LE: loop exit
PB: predicated region body
PF: predicated region fallthrough
CT: control target
= control target key end

     0   :  { %8 = vsyncpa [#allocation4], 0  ;;  %s311_s0 = inlined_call_operand.hbm [shape: f32[16,32], index: 0, kind: input, shape index: {}]   ;;  %s312_s1 = inlined_call_operand.hbm [shape: f32[32,96], index: 1, kind: input, shape index: {}]   ;;  %s313_s2 = inlined_call_operand.vmem [shape: f32[1,96], index: 2, kind: input, shape index: {}]   ;;  %s314_s3 = inlined_call_operand.vmem [shape: f32[16,96], index: 3, kind: output, shape index: {}]  }
   0x1   :  { %9 = vsyncpa [#allocation6], 0  ;;  %s247_s12 = smov [#allocation3]   ;;  %s199_s16 = scalar_lea.hbm %s311_s0, 256 }
   0x2   :  { %s15_s13 = sshll.u32 %s247_s12, 4  ;;  %p200_p0 = scmp.ne.s32.totalorder %s311_s0, %s199_s16  ;;  %s16_s13 = int_to_ptr.vmem [resolvable:$true] %s15_s13 }
   0x3   :  { %p203_p1 = scmp.lt.u32.totalorder %s199_s16, %s311_s0 }
   0x5   :  { %p205_p2 = pnand %p203_p1, %p200_p0 }
   0x7   :  { %208 = shalt.err (!%p205_p2)
}
   0x8   :  { %s209_s21 = scalar_lea.vmem %s16_s13, 256  ;;  %p214_p4 = scmp.lt.s32.totalorder %s16_s13, %s16_s13 }
   0x9   :  { %p210_p3 = scmp.ne.s32.totalorder %s16_s13, %s209_s21  ;;  %p215_p5 = scmp.lt.s32.totalorder %s209_s21, %s209_s21 }
   0xb   :  { %p216_p6 = por %p215_p5, %p214_p4 }
   0xd   :  { %p217_p7 = pnand %p216_p6, %p210_p3 }
   0xf   :  { %220 = shalt.err (!%p217_p7)
}
  0x10   :  { %s248_s22 = smov 128   ;;  %s249_s23 = smov 8  }
  0x11   :  { %21 = dma.hbm_to_vmem [thread:$0]  %s311_s0, 256, %s16_s13, [#allocation4], %s248_s22, %s248_s22, %s249_s23  }
  0x12   :  { %s250_s26 = smov [#allocation5]   ;;  %s221_s30 = scalar_lea.hbm %s312_s1, 512 }
  0x13   :  { %s27_s27 = sshll.u32 %s250_s26, 4  ;;  %p222_p8 = scmp.ne.s32.totalorder %s312_s1, %s221_s30  ;;  %s28_s27 = int_to_ptr.vmem [resolvable:$true] %s27_s27 }
  0x14   :  { %p225_p9 = scmp.lt.u32.totalorder %s221_s30, %s312_s1 }
  0x16   :  { %p227_p10 = pnand %p225_p9, %p222_p8 }
  0x18   :  { %230 = shalt.err (!%p227_p10)
}
  0x19   :  { %s231_s8 = scalar_lea.vmem %s28_s27, 512  ;;  %p236_p12 = scmp.lt.s32.totalorder %s28_s27, %s28_s27 }
  0x1a   :  { %p232_p11 = scmp.ne.s32.totalorder %s28_s27, %s231_s8  ;;  %p237_p13 = scmp.lt.s32.totalorder %s231_s8, %s231_s8 }
  0x1c   :  { %p238_p0 = por %p237_p13, %p236_p12 }
  0x1e   :  { %p239_p1 = pnand %p238_p0, %p232_p11 }
  0x20   :  { %242 = shalt.err (!%p239_p1)
}
  0x21   :  { %33 = dma.hbm_to_vmem [thread:$0]  %s312_s1, 512, %s28_s27, [#allocation6], %s248_s22, %s248_s22, %s249_s23  }
  0x22   :  { %243 = dma.done.wait [#allocation4], 256  }
  0x23   :  { %244 = vsyncadd [#allocation4], 4294967040 }
  0x24   :  { %245 = dma.done.wait [#allocation6], 512  }
  0x25   :  { %246 = vsyncadd [#allocation6], 4294966784  ;;  %vm46_vm0 = vcmask 785408   ;;  %v251_v0 = vmov 0.0   ;;  %vm57_vm1 = vcmask 261120   ;;  %v53_v1 = vld [vmem:[#allocation5] sm:$0xff] }
  0x26   :  { %48 = vst.msk [vmem:[#allocation2 + $0x8] sm:$0xff] %vm46_vm0, %v251_v0  ;;  %47 = vst.msk [vmem:[#allocation2] sm:$0xff] %vm46_vm0, %v251_v0  ;;  %v54_v2 = vld [vmem:[#allocation5 + $0x8] sm:$0xff]  ;;  %v55_v3 = vld [vmem:[#allocation5 + $0x10] sm:$0xff] }
  0x27   :  { %v186_v4 = vpack.c.bf16 %v54_v2, %v53_v1  ;;  %v56_v5 = vld [vmem:[#allocation5 + $0x18] sm:$0xff]  ;;  %v51_v6 = vld [vmem:[#allocation3] sm:$0xff]  ;;  %v168_v15 = vld [vmem:[%s313_s2] ss:$0 sm:$0xff] }
  0x28   :  { %v190_v7 = vpack.c.bf16 %v56_v5, %v55_v3  ;;  %183 = vmatprep.mubr.msk.f32.mxu0 %vm57_vm1, %v51_v6  ;;  %v52_v8 = vld [vmem:[#allocation3 + $0x8] sm:$0xff] }
  0x29   :  { %187 = vmatprep.subr.bf16.mxu0 %v186_v4 }
  0x2a   :  { %189 = vmatpush3.bf16.msra.mxu0 %v186_v4 }
  0x2b   :  { %191 = vmatprep.subr.bf16.mxu0 %v190_v7 }
  0x2d   :  { %v50_v9 = vld [vmem:[#allocation2 + $0x8] sm:$0xff]  ;;  %v49_v10 = vld [vmem:[#allocation2] sm:$0xff] }
  0x2e   :  { %193 = vmatpush3.bf16.msra.mxu0 %v190_v7 }
  0x31   :  { %184 = vmatmul.mubr.msk.f32.vlgmr.msra.gmra.mrb[0].mxu0 %vm57_vm1, %v52_v8 }
 0x104   :  { %v185_v11 = vpop.f32.mrb[0].mxu0 }
 0x105   :  { %v140_v12 = vadd.f32 %v185_v11, %v50_v9  ;;  %v130_v13 = vpop.f32.mrb[1].mxu0 }
 0x106   :  { %v139_v14 = vadd.f32 %v130_v13, %v49_v10 }
 0x107   :  { %143 = vst.msk [vmem:[#allocation2 + $0x8] sm:$0xff] %vm46_vm0, %v140_v12 }
 0x108   :  { %142 = vst.msk [vmem:[#allocation2] sm:$0xff] %vm46_vm0, %v139_v14 }
 0x10e   :  { %v148_v16 = vld [vmem:[#allocation2 + $0x8] sm:$0xff] }
 0x10f   :  { %v157_v17 = vadd.f32 %v168_v15, %v148_v16  ;;  %v147_v18 = vld [vmem:[#allocation2] sm:$0xff] }
 0x110   :  { %v156_v19 = vadd.f32 %v168_v15, %v147_v18 }
 0x111   :  { %159 = vst.msk [vmem:[%s314_s3 + $0x8] sm:$0xff] %vm46_vm0, %v157_v17 }
 0x112   :  { %158 = vst.msk [vmem:[%s314_s3] sm:$0xff] %vm46_vm0, %v156_v19 }
 0x113   :  { %164 = vsyncpa [#allocation4], 1 }
 0x114   :  { %165 = vsyncpa [#allocation6], 1 }

// kernel: attention_forward.3
= control target key start
LH: loop header
LB: loop body
LE: loop exit
PB: predicated region body
PF: predicated region fallthrough
CT: control target
= control target key end

     0   :  { %10 = vsyncpa [#allocation6], 0  ;;  %s2149_s0 = inlined_call_operand.vmem [shape: f32[2,12,8,8], index: 0, kind: input, shape index: {}, may-alias: {0,1,2}]   ;;  %s2150_s1 = inlined_call_operand.vmem [shape: f32[2,12,8,8], index: 1, kind: input, shape index: {}, may-alias: {0,1,2}]   ;;  %s2151_s2 = inlined_call_operand.vmem [shape: f32[2,12,8,8], index: 2, kind: input, shape index: {}, may-alias: {0,1,2}]   ;;  %s2152_s3 = inlined_call_operand.vmem [shape: f32[4,8,32], index: 3, kind: input, shape index: {}]   ;;  %s2153_s4 = inlined_call_operand.vmem [shape: f32[1,32], index: 4, kind: input, shape index: {}]   ;;  %s2154_s5 = inlined_call_operand.hbm [shape: f32[2,8,32], index: 5, kind: output, shape index: {}]  }
   0x1   :  { %12 = vsyncpa [#allocation6 + $0x1], 0  ;;  %s1893_s18 = smov 0   ;;  %s1895_s19 = smov 0  }
   0x2   :  { %s1897_s20 = smov 0   ;;  %s1899_s21 = smov 0  }
   0x3   :  { %s1901_s22 = smov 0   ;;  %s1903_s23 = smov 0  }
   0x4 LB: > { %s1567_s24 = sadd.s32 4294967295, %s1856_s23   ;;  %s1568_s25 = sadd.s32 4294967294, %s1856_s23   ;;  %s1856_s23 = sphi %s1903_s23, %s18_s23   ;;  %s1852_s22 = sphi %s1901_s22, %s2161_s22   ;;  %s1848_s21 = sphi %s1899_s21, %s2160_s21   ;;  %s1844_s20 = sphi %s1897_s20, %s2159_s20   ;;  %s1840_s19 = sphi %s1895_s19, %s2158_s19   ;;  %s1836_s18 = sphi %s1893_s18, %s2157_s18  }
   0x5   : > { %s37_s26 = sadd.s32 1, %s1852_s22  ;;  %s172_s27 = sadd.s32 1, %s1844_s20 }
   0x6   : > { %p39_p0 = scmp.ge.s32.totalorder %s37_s26, 2  ;;  %p182_p1 = scmp.ne.s32.totalorder %s1844_s20, %s1840_s19 }
   0x7   : > { %p183_p2 = scmp.eq.s32.totalorder %s1567_s24, 1  ;;  %p188_p3 = scmp.ne.s32.totalorder %s1840_s19, %s1836_s18 }
   0x8   : > { %s2163_s26 = smov (%p39_p0, %s37_s26), 0  ;;  %p189_p5 = scmp.eq.s32.totalorder %s1568_s25, 1 }
   0x9   : > { %p1933_p4 = por %p183_p2, %p182_p1  ;;  %s167_s29 = ssub.s32 %s1852_s22, %s2163_s26 }
   0xa   : > { %p1571_p6 = scmp.ge.s32.totalorder %s1856_s23, 1  ;;  %p170_p7 = scmp.eq.s32.totalorder %s167_s29, 0 }
   0xb   : > { %p1940_p8 = por %p189_p5, %p188_p3  ;;  %p248_p9 = scmp.lt.s32.totalorder %s1856_s23, 3 }
   0xc   : > { %s1946_s6 = scalar_select %p170_p7, %s1844_s20, %s172_s27  }
   0xd   : > { %p249_p10 = pnand %p1571_p6, %p248_p9 }
   0xe   : > { %p297_p11 = scmp.lt.s32.totalorder (!%p249_p10), %s1848_s21, 1  ;;  %vm336_vm0 = vcmask (!%p249_p10), 64512   ;;  %v1858_v0 = vmov (!%p249_p10), 0.0   ;;  %vm1859_vm1 = vmmov (!%p249_p10), 0   ;;  %vm327_vm2 = vcmask (!%p249_p10), 7168   ;;  %s1605_s15 = sshll.u32 (!%p249_p10), %s1848_s21, 7 }
   0xf   : > { %252 = sbr.rel (%p249_p10) target bundleno = 1067 (0x42b), region = 40  ;;  %1632 = vmatprep.subr.mxu0 (!%p249_p10), %v1858_v0  ;;  %337 = vst.msk [vmem:[#allocation4] sm:$0xff] (!%p249_p10), %vm336_vm0, %v1858_v0  ;;  %338 = vst.msk [vmem:[#allocation4 + $0x8] sm:$0xff] (!%p249_p10), %vm336_vm0, %v1858_v0  ;;  %1634 = vmatprep.mubr.msk.f32.mxu0 (!%p249_p10), %vm1859_vm1, %v1858_v0  ;;  %v1860_v9 = vmov (!%p249_p10), -inf   ;;  %v1861_v22 = vmov (!%p249_p10), 0   ;;  %vm1431_vm3 = vcmask (!%p249_p10), 261120   ;;  %s2102_s27 = scalar_lea.hbm (!%p249_p10), %s2154_s5, %s1605_s15 }
  0x10   : > { %339 = vst.msk [vmem:[#allocation4 + $0x10] sm:$0xff] (!%p249_p10), %vm336_vm0, %v1858_v0  ;;  %340 = vst.msk [vmem:[#allocation4 + $0x18] sm:$0xff] (!%p249_p10), %vm336_vm0, %v1858_v0  ;;  %1637 = vmatprep.subr.mxu1 (!%p249_p10), %v1858_v0  ;;  %1639 = vmatprep.mubr.msk.f32.mxu1 (!%p249_p10), %vm1859_vm1, %v1858_v0 }
  0x11   : > { %328 = vst.msk [vmem:[#allocation2] sm:$0xff] (!%p249_p10), %vm327_vm2, %v1860_v9  ;;  %329 = vst.msk [vmem:[#allocation2 + $0x8] sm:$0xff] (!%p249_p10), %vm327_vm2, %v1860_v9  ;;  %1752 = vset.pattern.permute.xlu0 (!%p249_p10), %v1861_v22  ;;  %1753 = vset.pattern.permute.xlu1 (!%p249_p10), %v1861_v22 }
  0x12   : > { %330 = vst.msk [vmem:[#allocation2 + $0x10] sm:$0xff] (!%p249_p10), %vm327_vm2, %v1860_v9  ;;  %331 = vst.msk [vmem:[#allocation2 + $0x18] sm:$0xff] (!%p249_p10), %vm327_vm2, %v1860_v9 }
  0x13   : > { %332 = vst.msk [vmem:[#allocation3] sm:$0xff] (!%p249_p10), %vm327_vm2, %v1858_v0  ;;  %333 = vst.msk [vmem:[#allocation3 + $0x8] sm:$0xff] (!%p249_p10), %vm327_vm2, %v1858_v0 }
  0x14   : > { %334 = vst.msk [vmem:[#allocation3 + $0x10] sm:$0xff] (!%p249_p10), %vm327_vm2, %v1858_v0  ;;  %335 = vst.msk [vmem:[#allocation3 + $0x18] sm:$0xff] (!%p249_p10), %vm327_vm2, %v1858_v0 }
  0x16   : > { %s298_s7 = scalar_select %p297_p11, %s1848_s21, 1 }
  0x17   : > { %s1862_s21 = smov [#allocation5]  }
  0x18   : > { %s1964_s8 = smul.u32 96, %s298_s7  ;;  %v2010_v23 = vld [vmem:[#allocation2] sm:$0xff]  ;;  %v2013_v26 = vld [vmem:[#allocation2 + $0x8] sm:$0xff] }
  0x19   : > { %v2015_v27 = vld [vmem:[#allocation2 + $0x10] sm:$0xff]  ;;  %v2025_v33 = vld [vmem:[#allocation2 + $0x18] sm:$0xff] }
  0x1a   : > { %s1507_s11 = scalar_lea.vmem %s2150_s1, %s1964_s8  ;;  %s304_s14 = scalar_lea.vmem %s2149_s0, %s1964_s8 }
  0x1b   : > { %v1576_v1 = vld [vmem:[%s1507_s11 + $0x20] sm:$0xff]  ;;  %v1577_v2 = vld [vmem:[%s1507_s11 + $0x28] sm:$0xff]  ;;  %v1578_v5 = vld [vmem:[%s1507_s11 + $0x30] sm:$0xff]  ;;  %s1512_s17 = scalar_lea.vmem %s2151_s2, %s1964_s8  ;;  %s1782_s8 = sshll.u32 %s1862_s21, 4  ;;  %s1783_s8 = int_to_ptr.vmem [resolvable:$false] %s1782_s8 }
  0x1c   : > { %1633 = vmatpush3.xpose.msk.msra.mxu0 %vm336_vm0, %v1576_v1  ;;  %v341_v3 = vld [vmem:[%s304_s14] sm:$0xff]  ;;  %1638 = vmatpush3.xpose.msk.msra.mxu1 %vm336_vm0, %v1577_v2  ;;  %v342_v4 = vld [vmem:[%s304_s14 + $0x8] sm:$0xff]  ;;  %v1579_v6 = vld [vmem:[%s1507_s11 + $0x38] sm:$0xff]  ;;  %s294_s11 = sand.u32 1, %s1840_s19   ;;  %s1784_s9 = scalar_lea.vmem %s1783_s8, 256 }
  0x1d   : > { %1642 = vmatprep.subr.mxu0 %v1858_v0  ;;  %1647 = vmatprep.subr.mxu1 %v1858_v0  ;;  %v343_v7 = vld [vmem:[%s304_s14 + $0x10] sm:$0xff]  ;;  %v344_v8 = vld [vmem:[%s304_s14 + $0x18] sm:$0xff]  ;;  %v1580_v39 = vld [vmem:[%s1512_s17 + $0x40] sm:$0xff]  ;;  %s1572_s12 = sshll.u32 %s294_s11, 3  ;;  %s1434_s29 = scalar_lea.sflag [#allocation6], %s294_s11 }
  0x1e   : > { %v1581_v40 = vld [vmem:[%s1512_s17 + $0x48] sm:$0xff]  ;;  %v1582_v52 = vld [vmem:[%s1512_s17 + $0x50] sm:$0xff]  ;;  %v1583_v56 = vld [vmem:[%s1512_s17 + $0x58] sm:$0xff]  ;;  %s296_s16 = scalar_lea.vmem [#allocation5], %s1572_s12 }
  0x1f   : > { %1635 = vmatmul.mubr.msk.f32.vlgmr.msra.gmra.mrb[0].mxu0 %vm336_vm0, %v341_v3  ;;  %1640 = vmatmul.mubr.msk.f32.vlgmr.msra.gmra.mrb[0].mxu1 %vm336_vm0, %v342_v4  ;;  %s1448_s17 = sshll.u32 %s296_s16, 4  ;;  %s2104_s17 = int_to_ptr.vmem [resolvable:$true] %s1448_s17 }
  0x20   : > { %1643 = vmatpush3.xpose.msk.msra.mxu0 %vm336_vm0, %v1578_v5  ;;  %1644 = vmatprep.mubr.msk.f32.mxu0 %vm1859_vm1, %v1858_v0  ;;  %s1778_s7 = scalar_lea.vmem %s2104_s17, 128  ;;  %p1785_p1 = scmp.lt.s32.totalorder %s2104_s17, %s1783_s8 }
  0x21   : > { %1648 = vmatpush3.xpose.msk.msra.mxu1 %vm336_vm0, %v1579_v6  ;;  %1649 = vmatprep.mubr.msk.f32.mxu1 %vm1859_vm1, %v1858_v0  ;;  %p1779_p12 = scmp.ne.s32.totalorder %s2104_s17, %s1778_s7  ;;  %p1786_p2 = scmp.lt.s32.totalorder %s1784_s9, %s1778_s7 }
  0x22   : > { %1652 = vmatprep.subr.mxu0 %v1858_v0  ;;  %1657 = vmatprep.subr.mxu1 %v1858_v0 }
  0x23   : > { %1645 = vmatmul.mubr.msk.f32.vlgmr.msra.gmra.mrb[2].mxu0 %vm336_vm0, %v343_v7  ;;  %p1780_p13 = pnand %p1779_p12, %p1933_p4  ;;  %p1787_p3 = por %p1786_p2, %p1785_p1 }
  0x24   : > { %1650 = vmatmul.mubr.msk.f32.vlgmr.msra.gmra.mrb[2].mxu1 %vm336_vm0, %v344_v8  ;;  %1654 = vmatprep.mubr.msk.f32.mxu0 %vm1859_vm1, %v1858_v0  ;;  %v722_v8 = vld [vmem:[#allocation3] sm:$0xff] }
  0x25   : > { %1659 = vmatprep.mubr.msk.f32.mxu1 %vm1859_vm1, %v1858_v0  ;;  %1653 = vmatpush3.msra.mxu0 %v1580_v39  ;;  %p1781_p0 = pneg %p1780_p13 }
  0x26   : > { %1662 = vmatprep.subr.mxu0 %v1858_v0  ;;  %1658 = vmatpush3.msra.mxu1 %v1581_v40 }
  0x27   : > { %1667 = vmatprep.subr.mxu1 %v1858_v0  ;;  %p1788_p5 = pnand %p1787_p3, %p1781_p0 }
  0xf2   : > { %v426_v10 = vpop.f32.mrb[0].mxu0  ;;  %v502_v11 = vpop.f32.mrb[0].mxu1 }
  0xf3   : > { %v1636_v12 = vpop.f32.mrb[1].mxu0  ;;  %v662_v13 = vsel %vm336_vm0, %v426_v10, -inf  ;;  %v1641_v14 = vpop.f32.mrb[1].mxu1  ;;  %v665_v15 = vsel %vm336_vm0, %v502_v11, -inf }
  0xf4   : > { %663 = vmax.xlane.f32.xlu0 %v662_v13 }
  0xf6   : > { %v578_v16 = vpop.f32.mrb[2].mxu0 }
  0xf7   : > { %v1646_v17 = vpop.f32.mrb[3].mxu0  ;;  %v668_v18 = vsel %vm336_vm0, %v578_v16, -inf  ;;  %v654_v19 = vpop.f32.mrb[2].mxu1 }
  0xf8   : > { %666 = vmax.xlane.f32.xlu0 %v665_v15  ;;  %669 = vmax.xlane.f32.xlu1 %v668_v18  ;;  %v1651_v20 = vpop.f32.mrb[3].mxu1  ;;  %v671_v21 = vsel %vm336_vm0, %v654_v19, -inf  ;;  %v724_v15 = vld [vmem:[#allocation3 + $0x10] sm:$0xff] }
  0xfc   : > { %672 = vmax.xlane.f32.xlu1 %v671_v21 }
 0x181   : > { %v664_v24 = vpop.xlane.xlu0 %663 }
 0x182   : > { %v674_v25 = vmax.f32 %v2010_v23, %v664_v24 }
 0x184   : > { %v678_v28 = vsub.f32 %v2010_v23, %v674_v25  ;;  %1079 = vst.msk [vmem:[#allocation2] sm:$0xff] %vm327_vm2, %v674_v25  ;;  %692 = vperm.xlu0 %1752, %v674_v25  }
 0x185   : > { %v667_v29 = vpop.xlane.xlu0 %666  ;;  %v670_v30 = vpop.xlane.xlu1 %669 }
 0x186   : > { %v2020_v31 = vmax.f32 %v2013_v26, %v667_v29  ;;  %v2023_v32 = vmax.f32 %v2015_v27, %v670_v30  ;;  %v682_v60 = vmul.f32 1.442695, %v678_v28  ;;  %v1122_v29 = vld [vmem:[%s2152_s3] sm:$0xff] }
 0x188   : > { %v679_v34 = vsub.f32 %v2013_v26, %v2020_v31  ;;  %1080 = vst.msk [vmem:[#allocation2 + $0x8] sm:$0xff] %vm327_vm2, %v2020_v31  ;;  %697 = vperm.xlu1 %1753, %v2020_v31   ;;  %v680_v35 = vsub.f32 %v2015_v27, %v2023_v32  ;;  %1081 = vst.msk [vmem:[#allocation2 + $0x10] sm:$0xff] %vm327_vm2, %v2023_v32  ;;  %v1596_v31 = vld [vmem:[%s2152_s3 + $0x8] sm:$0xff] }
 0x189   : > { %v673_v36 = vpop.xlane.xlu1 %672 }
 0x18a   : > { %v677_v37 = vmax.f32 %v2025_v33, %v673_v36  ;;  %v684_v1 = vmul.f32 1.442695, %v679_v34  ;;  %v686_v2 = vmul.f32 1.442695, %v680_v35  ;;  %v751_v34 = vld [vmem:[#allocation4] sm:$0xff] }
 0x18c   : > { %702 = vperm.xlu1 %1753, %v2023_v32   ;;  %v681_v38 = vsub.f32 %v2025_v33, %v677_v37  ;;  %1082 = vst.msk [vmem:[#allocation2 + $0x18] sm:$0xff] %vm327_vm2, %v677_v37 }
 0x18e   : > { %v688_v4 = vmul.f32 1.442695, %v681_v38  ;;  %v752_v38 = vld [vmem:[#allocation4 + $0x8] sm:$0xff] }
 0x190   : > { %707 = vperm.xlu1 %1753, %v677_v37  }
 0x203   : > { %v693_v41 = vpop.permute.xlu0 %692 }
 0x204   : > { %v710_v42 = vsub.f32 %v426_v10, %v693_v41 }
 0x206   : > { %v714_v43 = vmul.f32 1.442695, %v710_v42 }
 0x207   : > { %v698_v44 = vpop.permute.xlu1 %697 }
 0x208   : > { %1754 = vpow2.f32 %v714_v43  ;;  %v711_v45 = vsub.f32 %v502_v11, %v698_v44  ;;  %v723_v11 = vld [vmem:[#allocation3 + $0x8] sm:$0xff]  ;;  %v753_v44 = vld [vmem:[#allocation4 + $0x10] sm:$0xff] }
 0x20a   : > { %v716_v46 = vmul.f32 1.442695, %v711_v45 }
 0x20b   : > { %v703_v47 = vpop.permute.xlu1 %702 }
 0x20c   : > { %1756 = vpow2.f32 %v716_v46  ;;  %v712_v48 = vsub.f32 %v578_v16, %v703_v47 }
 0x20e   : > { %v718_v49 = vmul.f32 1.442695, %v712_v48 }
 0x20f   : > { %v708_v50 = vpop.permute.xlu1 %707 }
 0x210   : > { %1758 = vpow2.f32 %v718_v49  ;;  %v713_v51 = vsub.f32 %v654_v19, %v708_v50  ;;  %v725_v19 = vld [vmem:[#allocation3 + $0x18] sm:$0xff] }
 0x211   : > { %v754_v49 = vld [vmem:[#allocation4 + $0x18] sm:$0xff] }
 0x212   : > { %v1755_v53 = vpop.eup %1754  ;;  %v720_v54 = vmul.f32 1.442695, %v713_v51 }
 0x213   : > { %1655 = vmatmul.mubr.msk.f32.vlgmr.msra.gmra.mrb[4].mxu0 %vm336_vm0, %v1755_v53  ;;  %v730_v55 = vsel %vm336_vm0, %v1755_v53, 0.0 }
 0x214   : > { %1760 = vpow2.f32 %v720_v54  ;;  %731 = vadd.xlane.f32.xlu0 %v730_v55  ;;  %1663 = vmatpush3.msra.mxu0 %v1582_v52 }
 0x215   : > { %1664 = vmatprep.mubr.msk.f32.mxu0 %vm1859_vm1, %v1858_v0  ;;  %1672 = vmatprep.subr.mxu0 %v1858_v0  ;;  %1762 = vpow2.f32 %v682_v60 }
 0x216   : > { %v1757_v57 = vpop.eup %1756  ;;  %1764 = vpow2.f32 %v684_v1 }
 0x217   : > { %1660 = vmatmul.mubr.msk.f32.vlgmr.msra.gmra.mrb[4].mxu1 %vm336_vm0, %v1757_v57  ;;  %v733_v58 = vsel %vm336_vm0, %v1757_v57, 0.0  ;;  %1766 = vpow2.f32 %v686_v2  ;;  %v1599_v2 = vld [vmem:[%s2152_s3 + $0x10] sm:$0xff] }
 0x218   : > { %734 = vadd.xlane.f32.xlu1 %v733_v58  ;;  %1668 = vmatpush3.msra.mxu1 %v1583_v56  ;;  %1768 = vpow2.f32 %v688_v4 }
 0x219   : > { %1669 = vmatprep.mubr.msk.f32.mxu1 %vm1859_vm1, %v1858_v0  ;;  %1677 = vmatprep.subr.mxu1 %v1858_v0 }
 0x21a   : > { %v1759_v59 = vpop.eup %1758 }
 0x21b   : > { %1665 = vmatmul.mubr.msk.f32.vlgmr.msra.gmra.mrb[6].mxu0 %vm336_vm0, %v1759_v59  ;;  %v736_v61 = vsel %vm336_vm0, %v1759_v59, 0.0 }
 0x21c   : > { %737 = vadd.xlane.f32.xlu1 %v736_v61  ;;  %1674 = vmatprep.mubr.msk.f32.mxu0 %vm1859_vm1, %v1858_v0  ;;  %v1601_v61 = vld [vmem:[%s2152_s3 + $0x18] sm:$0xff] }
 0x21d   : > { %1673 = vmatpush3.msra.mxu0 %v1596_v31 }
 0x21e   : > { %v1761_v62 = vpop.eup %1760  ;;  %1682 = vmatprep.subr.mxu0 %v1858_v0 }
 0x21f   : > { %1670 = vmatmul.mubr.msk.f32.vlgmr.msra.gmra.mrb[6].mxu1 %vm336_vm0, %v1761_v62  ;;  %v739_v63 = vsel %vm336_vm0, %v1761_v62, 0.0  ;;  %v1763_v3 = vpop.eup %1762 }
 0x220   : > { %740 = vadd.xlane.f32.xlu1 %v739_v63  ;;  %1679 = vmatprep.mubr.msk.f32.mxu1 %vm1859_vm1, %v1858_v0  ;;  %v1765_v5 = vpop.eup %1764  ;;  %v726_v9 = vmul.f32 %v1763_v3, %v722_v8 }
 0x221   : > { %v1767_v6 = vpop.eup %1766  ;;  %v727_v13 = vmul.f32 %v1765_v5, %v723_v11  ;;  %1678 = vmatpush3.msra.mxu1 %v1122_v29 }
 0x222   : > { %v1769_v7 = vpop.eup %1768  ;;  %v728_v17 = vmul.f32 %v1767_v6, %v724_v15  ;;  %1687 = vmatprep.subr.mxu1 %v1858_v0 }
 0x223   : > { %v729_v22 = vmul.f32 %v1769_v7, %v725_v19 }
 0x22a   : > { %757 = vperm.xlu0 %1752, %v1763_v3  }
 0x231   : > { %762 = vperm.xlu1 %1753, %v1765_v5  }
 0x235   : > { %767 = vperm.xlu1 %1753, %v1767_v6  }
 0x239   : > { %772 = vperm.xlu1 %1753, %v1769_v7  }
 0x2a1   : > { %v732_v10 = vpop.xlane.xlu0 %731 }
 0x2a2   : > { %v742_v12 = vadd.f32 %v732_v10, %v726_v9 }
 0x2a4   : > { %747 = vst.msk [vmem:[#allocation3] sm:$0xff] %vm327_vm2, %v742_v12 }
 0x2a5   : > { %v735_v14 = vpop.xlane.xlu1 %734 }
 0x2a6   : > { %v743_v16 = vadd.f32 %v735_v14, %v727_v13 }
 0x2a8   : > { %748 = vst.msk [vmem:[#allocation3 + $0x8] sm:$0xff] %vm327_vm2, %v743_v16 }
 0x2a9   : > { %v738_v18 = vpop.xlane.xlu1 %737  ;;  %v758_v35 = vpop.permute.xlu0 %757 }
 0x2aa   : > { %v744_v20 = vadd.f32 %v738_v18, %v728_v17  ;;  %v775_v37 = vmul.f32 %v758_v35, %v751_v34  ;;  %v1603_v17 = vld [vmem:[%s2153_s4] ss:$0 sm:$0xff] }
 0x2ab   : > { %v1086_v21 = vld [vmem:[#allocation3] sm:$0xff] }
 0x2ac   : > { %749 = vst.msk [vmem:[#allocation3 + $0x10] sm:$0xff] %vm327_vm2, %v744_v20  ;;  %1770 = vrcp.f32 %v1086_v21 }
 0x2ad   : > { %v741_v23 = vpop.xlane.xlu1 %740 }
 0x2ae   : > { %v745_v24 = vadd.f32 %v741_v23, %v729_v22 }
 0x2af   : > { %v1087_v25 = vld [vmem:[#allocation3 + $0x8] sm:$0xff] }
 0x2b0   : > { %750 = vst.msk [vmem:[#allocation3 + $0x18] sm:$0xff] %vm327_vm2, %v745_v24  ;;  %1772 = vrcp.f32 %v1087_v25 }
 0x2b1   : > { %v763_v36 = vpop.permute.xlu1 %762 }
 0x2b2   : > { %v776_v43 = vmul.f32 %v763_v36, %v752_v38 }
 0x2b3   : > { %v1088_v26 = vld [vmem:[#allocation3 + $0x10] sm:$0xff] }
 0x2b4   : > { %1774 = vrcp.f32 %v1088_v26 }
 0x2b5   : > { %v768_v42 = vpop.permute.xlu1 %767 }
 0x2b6   : > { %v1771_v27 = vpop.eup %1770  ;;  %v777_v48 = vmul.f32 %v768_v42, %v753_v44 }
 0x2b7   : > { %1100 = vperm.xlu0 %1752, %v1771_v27   ;;  %v1089_v28 = vld [vmem:[#allocation3 + $0x18] sm:$0xff] }
 0x2b8   : > { %1776 = vrcp.f32 %v1089_v28 }
 0x2b9   : > { %v773_v50 = vpop.permute.xlu1 %772 }
 0x2ba   : > { %v1773_v30 = vpop.eup %1772  ;;  %v778_v54 = vmul.f32 %v773_v50, %v754_v49 }
 0x2bb   : > { %1105 = vperm.xlu1 %1753, %v1773_v30  }
 0x2be   : > { %v1775_v32 = vpop.eup %1774 }
 0x2bf   : > { %1110 = vperm.xlu1 %1753, %v1775_v32  }
 0x2c2   : > { %v1777_v33 = vpop.eup %1776 }
 0x2c3   : > { %1115 = vperm.xlu0 %1752, %v1777_v33  }
 0x2e6   : > { %v848_v39 = vpop.f32.mrb[4].mxu0 }
 0x2e7   : > { %v1071_v40 = vadd.f32 %v848_v39, %v775_v37  ;;  %v1656_v41 = vpop.f32.mrb[5].mxu0 }
 0x2e9   : > { %1075 = vst.msk [vmem:[#allocation4] sm:$0xff] %vm336_vm0, %v1071_v40 }
 0x2ea   : > { %v921_v45 = vpop.f32.mrb[4].mxu1 }
 0x2eb   : > { %v1072_v46 = vadd.f32 %v921_v45, %v776_v43  ;;  %v1661_v47 = vpop.f32.mrb[5].mxu1 }
 0x2ed   : > { %1076 = vst.msk [vmem:[#allocation4 + $0x8] sm:$0xff] %vm336_vm0, %v1072_v46 }
 0x2ee   : > { %v994_v51 = vpop.f32.mrb[6].mxu0 }
 0x2ef   : > { %v1073_v52 = vadd.f32 %v994_v51, %v777_v48  ;;  %v1666_v53 = vpop.f32.mrb[7].mxu0 }
 0x2f0   : > { %v1094_v59 = vld [vmem:[#allocation4] sm:$0xff] }
 0x2f1   : > { %1077 = vst.msk [vmem:[#allocation4 + $0x10] sm:$0xff] %vm336_vm0, %v1073_v52 }
 0x2f2   : > { %v1067_v55 = vpop.f32.mrb[6].mxu1 }
 0x2f3   : > { %v1074_v56 = vadd.f32 %v1067_v55, %v778_v54  ;;  %v1671_v57 = vpop.f32.mrb[7].mxu1 }
 0x2f4   : > { %v1095_v62 = vld [vmem:[#allocation4 + $0x8] sm:$0xff] }
 0x2f5   : > { %1078 = vst.msk [vmem:[#allocation4 + $0x18] sm:$0xff] %vm336_vm0, %v1074_v56 }
 0x2f8   : > { %v1096_v4 = vld [vmem:[#allocation4 + $0x10] sm:$0xff] }
 0x2fc   : > { %v1097_v7 = vld [vmem:[#allocation4 + $0x18] sm:$0xff] }
 0x336   : > { %v1101_v58 = vpop.permute.xlu0 %1100 }
 0x337   : > { %v1118_v60 = vmul.f32 %v1101_v58, %v1094_v59 }
 0x339   : > { %1680 = vmatmul.mubr.msk.f32.vlgmr.msra.gmra.mrb[8].mxu1 %vm336_vm0, %v1118_v60 }
 0x33a   : > { %v1106_v63 = vpop.permute.xlu1 %1105  ;;  %1688 = vmatpush3.msra.mxu1 %v1601_v61  ;;  %1689 = vmatprep.mubr.msk.f32.mxu1 %vm1859_vm1, %v1858_v0 }
 0x33b   : > { %v1119_v1 = vmul.f32 %v1106_v63, %v1095_v62 }
 0x33d   : > { %1675 = vmatmul.mubr.msk.f32.vlgmr.msra.gmra.mrb[8].mxu0 %vm336_vm0, %v1119_v1 }
 0x33e   : > { %v1111_v3 = vpop.permute.xlu1 %1110  ;;  %1683 = vmatpush3.msra.mxu0 %v1599_v2  ;;  %1684 = vmatprep.mubr.msk.f32.mxu0 %vm1859_vm1, %v1858_v0 }
 0x33f   : > { %v1120_v5 = vmul.f32 %v1111_v3, %v1096_v4 }
 0x341   : > { %1685 = vmatmul.mubr.msk.f32.vlgmr.msra.gmra.mrb[10].mxu0 %vm336_vm0, %v1120_v5 }
 0x342   : > { %v1116_v6 = vpop.permute.xlu0 %1115 }
 0x343   : > { %v1121_v8 = vmul.f32 %v1116_v6, %v1097_v7 }
 0x345   : > { %1690 = vmatmul.mubr.msk.f32.vlgmr.msra.gmra.mrb[10].mxu1 %vm336_vm0, %v1121_v8 }
 0x40c   : > { %v1267_v9 = vpop.f32.mrb[8].mxu1 }
 0x40d   : > { %v1681_v10 = vpop.f32.mrb[9].mxu1 }
 0x410   : > { %v1194_v11 = vpop.f32.mrb[8].mxu0 }
 0x411   : > { %v1268_v12 = vadd.f32 %v1267_v9, %v1194_v11  ;;  %v1676_v13 = vpop.f32.mrb[9].mxu0 }
 0x414   : > { %v1342_v14 = vpop.f32.mrb[10].mxu0 }
 0x415   : > { %v1346_v15 = vadd.f32 %v1342_v14, %v1268_v12  ;;  %v1686_v16 = vpop.f32.mrb[11].mxu0 }
 0x418   : > { %v1418_v0 = vpop.f32.mrb[10].mxu1 }
 0x419   : > { %v1422_v18 = vadd.f32 %v1418_v0, %v1346_v15  ;;  %v1691_v19 = vpop.f32.mrb[11].mxu1 }
 0x41b   : > { %v1430_v20 = vadd.f32 %v1603_v17, %v1422_v18 }
 0x41d   : > { %1432 = vst.msk [vmem:[%s296_s16] sm:$0xff] %vm1431_vm3, %v1430_v20 }
 0x41e   : > { %1791 = shalt.err (!%p1788_p5)
}
 0x41f   : > { %s1792_s10 = scalar_lea.hbm %s2102_s27, 128  ;;  %s1796_s13 = scalar_lea.hbm %s2154_s5, 256 }
 0x420   : > { %p1793_p6 = scmp.ne.s32.totalorder %s2102_s27, %s1792_s10  ;;  %p1797_p10 = scmp.lt.u32.totalorder %s2102_s27, %s2154_s5 }
 0x421   : > { %p1798_p11 = scmp.lt.u32.totalorder %s1796_s13, %s1792_s10  ;;  %p1800_p13 = scmp.lt.u32.totalorder %s1792_s10, %s2102_s27 }
 0x422   : > { %p1794_p7 = pnand %p1793_p6, %p1933_p4 }
 0x423   : > { %p1799_p12 = por %p1798_p11, %p1797_p10 }
 0x424   : > { %p1795_p9 = pneg %p1794_p7 }
 0x425   : > { %p1801_p0 = por %p1800_p13, %p1799_p12 }
 0x427   : > { %p1802_p1 = pnand %p1801_p0, %p1795_p9 }
 0x429   : > { %1805 = shalt.err (!%p1802_p1)
}
 0x42a   : > { %1693 = dma.vmem_to_hbm [thread:$0]  (%p1933_p4), %s2104_s17, 128, %s2102_s27, %s1434_s29  }
 0x42b PF: > { %p1699_p2 = scmp.ge.s32.totalorder %s1856_s23, 2  ;;  %s1460_s16 = sand.u32 1, %s1836_s18  }
 0x42c   : > { %s1461_s24 = scalar_lea.sflag [#allocation6], %s1460_s16 }
 0x42d   : > { %p1696_p3 = pnand %p1699_p2, %p1940_p8 }
 0x42f   : > { %1831 = dma.done.wait (!%p1696_p3), %s1461_s24, 128  }
 0x430   : > { %1833 = vsyncadd (!%p1696_p3), %s1461_s24, 4294967168  ;;  %s18_s23 = sadd.s32 1, %s1856_s23   ;;  %s2157_s18 = smov %s1840_s19 }
 0x431   : > { %p15_p5 = scmp.ge.s32.totalorder %s18_s23, 4   ;;  %s2158_s19 = smov %s1844_s20 }
 0x432   : > { %s2159_s20 = smov %s1946_s6  ;;  %s2160_s21 = smov %s1852_s22 }
 0x433   : > { %s2161_s22 = smov %s2163_s26  ;;  %17 = sbr.rel (!%p15_p5) target bundleno = 4 (0x4), region = 92 }
 0x43a   :  { %1466 = vsyncpa [#allocation6], 1 }
 0x43b   :  { %1468 = vsyncpa [#allocation6 + $0x1], 1 }

</bundles_post_ra>
